<compile_context>
chip_gen: v7x
topology: tpu7x:2x2x1
jax: 0.10.0
libtpu: 0.0.40
codegen_flags: <defaults>
</compile_context>

<pallas_src>
import jax
import jax.numpy as jnp
import numpy as np
from jax.experimental import pallas as pl
from jax.experimental.pallas import tpu as pltpu


def _round_up(x, m):
    return ((x + m - 1) // m) * m


# ----------------------------------------------------------------------------
# Kernel A: tiled matmul + bias   (M, K) @ (K, N) + (1, N) -> (M, N) f32
# ----------------------------------------------------------------------------
def _matmul_bias_kernel(x_ref, w_ref, b_ref, o_ref):
    o_ref[...] = (jnp.dot(x_ref[...], w_ref[...],
                          preferred_element_type=jnp.float32)
                  + b_ref[...])


def _matmul_bias(x, w, b):
    """x: (M, K) float, w: (K, N) bf16 with N % 128 == 0, b: (1, N) f32."""
    M, K = x.shape
    N = w.shape[1]
    x = x.astype(jnp.bfloat16)
    tm = 128 if M >= 128 else _round_up(M, 8)
    Mp = _round_up(M, tm)
    if Mp != M:
        x = jnp.pad(x, ((0, Mp - M), (0, 0)))
    tn = 256 if N % 256 == 0 else 128
    out = pl.pallas_call(
        _matmul_bias_kernel,
        out_shape=jax.ShapeDtypeStruct((Mp, N), jnp.float32),
        grid=(Mp // tm, N // tn),
        in_specs=[pl.BlockSpec((tm, K), lambda i, j: (i, 0)),
                  pl.BlockSpec((K, tn), lambda i, j: (0, j)),
                  pl.BlockSpec((1, tn), lambda i, j: (0, j))],
        out_specs=pl.BlockSpec((tm, tn), lambda i, j: (i, j)),
        compiler_params=pltpu.CompilerParams(
            dimension_semantics=("parallel", "parallel"),
            vmem_limit_bytes=32 * 1024 * 1024),
    )(x, w, b)
    return out[:M] if Mp != M else out


# ----------------------------------------------------------------------------
# Kernel B: 3-layer LSTM recurrence, grid over time (sequential / 'arbitrary')
# ----------------------------------------------------------------------------
def _lstm_kernel(g0_ref,                       # (Bp, 4Hp) f32  precomputed x@Wih0 + b0
                 whh0_ref,                     # (Hp, 4Hp) bf16
                 wih1_ref, whh1_ref, b1_ref,   # (Hp,4Hp) bf16, (Hp,4Hp) bf16, (1,4Hp) f32
                 wih2_ref, whh2_ref, b2_ref,
                 h_out_ref,                    # (Bp, Hp) f32
                 h_scr, c_scr):                # (3, Bp, Hp) f32 scratch, persists over grid
    Hp = whh0_ref.shape[0]

    @pl.when(pl.program_id(0) == 0)
    def _():
        h_scr[...] = jnp.zeros_like(h_scr)
        c_scr[...] = jnp.zeros_like(c_scr)

    def cell(gates, layer):
        # PyTorch gate order i, f, g, o; Hp is 128-aligned so slices are lane-aligned.
        i_g = jax.nn.sigmoid(gates[:, 0 * Hp:1 * Hp])
        f_g = jax.nn.sigmoid(gates[:, 1 * Hp:2 * Hp])
        g_g = jnp.tanh(gates[:, 2 * Hp:3 * Hp])
        o_g = jax.nn.sigmoid(gates[:, 3 * Hp:4 * Hp])
        c_new = f_g * c_scr[layer] + i_g * g_g
        h_new = o_g * jnp.tanh(c_new)
        h_scr[layer] = h_new
        c_scr[layer] = c_new
        return h_new

    def mm(a_f32, w_ref):                      # bf16 MXU matmul, f32 accumulate
        return jnp.dot(a_f32.astype(jnp.bfloat16), w_ref[...],
                       preferred_element_type=jnp.float32)

    # layer 0: input projection + bias already hoisted out of the recurrence.
    h0 = cell(g0_ref[...] + mm(h_scr[0], whh0_ref), 0)
    # layer 1
    h1 = cell(mm(h0, wih1_ref) + mm(h_scr[1], whh1_ref) + b1_ref[...], 1)
    # layer 2
    h2 = cell(mm(h1, wih2_ref) + mm(h_scr[2], whh2_ref) + b2_ref[...], 2)

    h_out_ref[...] = h2


# ----------------------------------------------------------------------------
# Weight padding helpers (pad each of the 4 gate blocks from H to Hp with zeros)
# ----------------------------------------------------------------------------
def _pad_gate_mat(w, H, Hp):
    """(4H, D) -> (4Hp, D), per-gate zero padding."""
    D = w.shape[-1]
    return jnp.pad(w.reshape(4, H, D), ((0, 0), (0, Hp - H), (0, 0))).reshape(4 * Hp, D)


def _pad_gate_bias(b, H, Hp):
    return jnp.pad(b.reshape(4, H), ((0, 0), (0, Hp - H))).reshape(1, 4 * Hp)


# ----------------------------------------------------------------------------
# Forward wrapper (matches DecoderRNN.forward semantics, eval mode)
# ----------------------------------------------------------------------------
def decoder_rnn_forward(features, captions, params):
    """features: (B, E) f32, captions: (B, L) int32. Returns (B, L, V) f32."""
    B, E = features.shape
    H = params["w_hh"][0].shape[1]            # w_hh is (4H, H)
    V = params["w_lin"].shape[0]
    Hp = _round_up(H, 128)
    Vp = _round_up(V, 128)
    Bp = _round_up(B, 8)

    # ---- glue: embedding gather + feature concat, built time-major ----
    emb_tm = jnp.take(params["embed"], captions[:, :-1].T, axis=0)       # (L-1, B, E)
    x_tm = jnp.concatenate([features[None, :, :], emb_tm], axis=0)       # (T, B, E)
    x_tm = x_tm.astype(jnp.float32)
    T = x_tm.shape[0]
    if Bp != B:
        x_tm = jnp.pad(x_tm, ((0, 0), (0, Bp - B), (0, 0)))

    # ---- padded / transposed weights (bf16 matmul operands, f32 biases) ----
    def gate_w(w, in_pad):
        wt = jnp.transpose(_pad_gate_mat(w, H, Hp))                      # (in, 4Hp)
        if in_pad is not None and in_pad != wt.shape[0]:
            wt = jnp.pad(wt, ((0, in_pad - wt.shape[0]), (0, 0)))
        return wt.astype(jnp.bfloat16)

    wih0 = gate_w(params["w_ih"][0], None)                               # (E, 4Hp)
    wih1 = gate_w(params["w_ih"][1], Hp)                                 # (Hp, 4Hp)
    wih2 = gate_w(params["w_ih"][2], Hp)
    whh0 = gate_w(params["w_hh"][0], Hp)
    whh1 = gate_w(params["w_hh"][1], Hp)
    whh2 = gate_w(params["w_hh"][2], Hp)
    b0 = _pad_gate_bias(params["b_ih"][0] + params["b_hh"][0], H, Hp).astype(jnp.float32)
    b1 = _pad_gate_bias(params["b_ih"][1] + params["b_hh"][1], H, Hp).astype(jnp.float32)
    b2 = _pad_gate_bias(params["b_ih"][2] + params["b_hh"][2], H, Hp).astype(jnp.float32)
    wlin = jnp.pad(jnp.transpose(params["w_lin"]),
                   ((0, Hp - H), (0, Vp - V))).astype(jnp.bfloat16)      # (Hp, Vp)
    blin = jnp.pad(params["b_lin"], (0, Vp - V)).reshape(1, Vp).astype(jnp.float32)

    # ---- kernel A: hoisted layer-0 input projection for all timesteps ----
    g0 = _matmul_bias(x_tm.reshape(T * Bp, E), wih0, b0).reshape(T, Bp, 4 * Hp)

    # ---- kernel B: 3-layer LSTM recurrence, grid over T ----
    w_spec = pl.BlockSpec((Hp, 4 * Hp), lambda t: (0, 0))
    b_spec = pl.BlockSpec((1, 4 * Hp), lambda t: (0, 0))
    hid_tm = pl.pallas_call(
        _lstm_kernel,
        out_shape=jax.ShapeDtypeStruct((T, Bp, Hp), jnp.float32),
        grid=(T,),
        in_specs=[pl.BlockSpec((None, Bp, 4 * Hp), lambda t: (t, 0, 0)),   # g0
                  w_spec,                                                  # whh0
                  w_spec, w_spec, b_spec,                                  # layer 1
                  w_spec, w_spec, b_spec],                                 # layer 2
        out_specs=pl.BlockSpec((None, Bp, Hp), lambda t: (t, 0, 0)),
        scratch_shapes=[pltpu.VMEM((3, Bp, Hp), jnp.float32),              # h per layer
                        pltpu.VMEM((3, Bp, Hp), jnp.float32)],             # c per layer
        compiler_params=pltpu.CompilerParams(
            dimension_semantics=("arbitrary",),        # sequential recurrence over T
            vmem_limit_bytes=32 * 1024 * 1024),
    )(g0, whh0, wih1, whh1, b1, wih2, whh2, b2)

    # ---- kernel A: vocab projection, batch-major rows => logits come out (B, T, V)
    hid_bm = jnp.transpose(hid_tm, (1, 0, 2)).reshape(Bp * T, Hp)
    logits = _matmul_bias(hid_bm, wlin, blin).reshape(Bp, T, Vp)
    return logits[:B, :, :V]


# ----------------------------------------------------------------------------
# Parameter init + pure-JAX reference (f32) for correctness check
# ----------------------------------------------------------------------------
def _init_params(key, embed_size, hidden_size, vocab_size):
    ks = jax.random.split(key, 16)
    s = 1.0 / np.sqrt(hidden_size)
    p = {}
    p["embed"] = jax.random.normal(ks[0], (vocab_size, embed_size), jnp.float32)
    w_ih, w_hh, b_ih, b_hh = [], [], [], []
    for l in range(3):
        in_dim = embed_size if l == 0 else hidden_size
        w_ih.append(jax.random.uniform(ks[1 + 4 * l], (4 * hidden_size, in_dim),
                                       jnp.float32, -s, s))
        w_hh.append(jax.random.uniform(ks[2 + 4 * l], (4 * hidden_size, hidden_size),
                                       jnp.float32, -s, s))
        b_ih.append(jax.random.uniform(ks[3 + 4 * l], (4 * hidden_size,),
                                       jnp.float32, -s, s))
        b_hh.append(jax.random.uniform(ks[4 + 4 * l], (4 * hidden_size,),
                                       jnp.float32, -s, s))
    p["w_ih"], p["w_hh"], p["b_ih"], p["b_hh"] = w_ih, w_hh, b_ih, b_hh
    p["w_lin"] = jax.random.uniform(ks[13], (vocab_size, hidden_size),
                                    jnp.float32, -s, s)
    p["b_lin"] = jax.random.uniform(ks[14], (vocab_size,), jnp.float32, -s, s)
    return p


def _reference(features, captions, params):
    B, E = features.shape
    H = params["w_hh"][0].shape[1]
    emb = jnp.take(params["embed"], captions[:, :-1], axis=0)
    inputs = jnp.concatenate([features.reshape(B, 1, E), emb], axis=1)
    T = inputs.shape[1]
    h = [jnp.zeros((B, H), jnp.float32) for _ in range(3)]
    c = [jnp.zeros((B, H), jnp.float32) for _ in range(3)]
    outs = []
    for t in range(T):
        x = inputs[:, t, :]
        for l in range(3):
            gates = (x @ params["w_ih"][l].T + h[l] @ params["w_hh"][l].T
                     + params["b_ih"][l] + params["b_hh"][l])
            i_g = jax.nn.sigmoid(gates[:, 0 * H:1 * H])
            f_g = jax.nn.sigmoid(gates[:, 1 * H:2 * H])
            g_g = jnp.tanh(gates[:, 2 * H:3 * H])
            o_g = jax.nn.sigmoid(gates[:, 3 * H:4 * H])
            c[l] = f_g * c[l] + i_g * g_g
            h[l] = o_g * jnp.tanh(c[l])
            x = h[l]
        outs.append(x @ params["w_lin"].T + params["b_lin"])
    return jnp.stack(outs, axis=1)


if __name__ == "__main__":
    embed_size, hidden_size, vocab_size = 32, 32, 48
    B, L = 2, 8                                   # batch, caption length

    key = jax.random.PRNGKey(0)
    kp, kf, kc = jax.random.split(key, 3)
    params = _init_params(kp, embed_size, hidden_size, vocab_size)
    features = jax.random.normal(kf, (B, embed_size), jnp.float32)
    captions = jax.random.randint(kc, (B, L), 0, vocab_size, jnp.int32)

    out = decoder_rnn_forward(features, captions, params)
    out = jax.block_until_ready(out)
    assert out.shape == (B, L, vocab_size), out.shape

    ref = jax.block_until_ready(_reference(features, captions, params))
    # bf16 MXU operands (f32 accumulation / gate math) -> slightly looser tolerance.
    np.testing.assert_allclose(np.asarray(out), np.asarray(ref), rtol=5e-2, atol=5e-2)

    print("KERNEL_OK")
</pallas_src>

<mosaic_0001>
module attributes {stable_mosaic.version = 11 : i64} {
  func.func @_matmul_bias_kernel(%arg0: i32, %arg1: i32, %arg2: memref<64x32xbf16, #tpu.memory_space<vmem>>, %arg3: memref<32x256xbf16, #tpu.memory_space<vmem>>, %arg4: memref<1x256xf32, #tpu.memory_space<vmem>>, %arg5: memref<64x256xf32, #tpu.memory_space<vmem>>) attributes {dimension_semantics = [#tpu.dimension_semantics<parallel>, #tpu.dimension_semantics<parallel>], iteration_bounds = array<i64: 1, 2>, scalar_prefetch = 0 : i64, scratch_operands = 0 : i64, tpu.core_type = #tpu.core_type<tc>, window_params = [{transform_indices = @transform_0, window_bounds = array<i64: 64, 32>}, {transform_indices = @transform_1, window_bounds = array<i64: 32, 256>}, {transform_indices = @transform_2, window_bounds = array<i64: 1, 256>}, {transform_indices = @transform_3, window_bounds = array<i64: 64, 256>}]} {
    %c0 = arith.constant 0 : index
    %c0_0 = arith.constant 0 : index
    %0 = vector.load %arg2[%c0, %c0_0] : memref<64x32xbf16, #tpu.memory_space<vmem>>, vector<64x32xbf16>
    %c0_1 = arith.constant 0 : index
    %c0_2 = arith.constant 0 : index
    %1 = vector.load %arg3[%c0_1, %c0_2] : memref<32x256xbf16, #tpu.memory_space<vmem>>, vector<32x256xbf16>
    %cst = arith.constant dense<0.000000e+00> : vector<64x256xf32>
    %2 = tpu.matmul %0, %1, %cst {dimension_numbers = #tpu.dot_dimension_numbers<[1], [0], [0], [1], [0, 0, 1, 1], [], []>} : vector<64x32xbf16>, vector<32x256xbf16>, vector<64x256xf32> -> vector<64x256xf32>
    %c0_3 = arith.constant 0 : index
    %c0_4 = arith.constant 0 : index
    %3 = vector.load %arg4[%c0_3, %c0_4] : memref<1x256xf32, #tpu.memory_space<vmem>>, vector<1x256xf32>
    %4 = vector.broadcast %3 : vector<1x256xf32> to vector<64x256xf32>
    %5 = arith.addf %2, %4 : vector<64x256xf32>
    %c0_5 = arith.constant 0 : index
    %c0_6 = arith.constant 0 : index
    %6 = vector.load %arg5[%c0_5, %c0_6] : memref<64x256xf32, #tpu.memory_space<vmem>>, vector<64x256xf32>
    tpu.vector_store %arg5[%c0_5, %c0_6], %5 {strides = array<i32>} : memref<64x256xf32, #tpu.memory_space<vmem>>, vector<64x256xf32>,
    return
  }
  func.func @transform_0(%arg0: i32, %arg1: i32) -> (i32, i32) {
    %c0_i32 = arith.constant 0 : i32
    %c0_i32_0 = arith.constant 0 : i32
    return %arg0, %c0_i32 : i32, i32
  }
  func.func @transform_1(%arg0: i32, %arg1: i32) -> (i32, i32) {
    %c0_i32 = arith.constant 0 : i32
    %c0_i32_0 = arith.constant 0 : i32
    return %c0_i32, %arg1 : i32, i32
  }
  func.func @transform_2(%arg0: i32, %arg1: i32) -> (i32, i32) {
    %c0_i32 = arith.constant 0 : i32
    %c0_i32_0 = arith.constant 0 : i32
    return %c0_i32, %arg1 : i32, i32
  }
  func.func @transform_3(%arg0: i32, %arg1: i32) -> (i32, i32) {
    %c0_i32 = arith.constant 0 : i32
    return %arg0, %arg1 : i32, i32
  }
}

</mosaic_0001>

<bundles_post_ra>
// kernel: tpu_custom_call.1
= control target key start
LH: loop header
LB: loop body
LE: loop exit
PB: predicated region body
PF: predicated region fallthrough
CT: control target
= control target key end

     0   :  { %8 = vsyncpa [#allocation3], 0  ;;  %s1005_s0 = inlined_call_operand.vmem [shape: bf16[64,32], index: 0, kind: input, shape index: {}]   ;;  %s1006_s1 = inlined_call_operand.hbm [shape: bf16[32,512], index: 1, kind: input, shape index: {}]   ;;  %s1007_s2 = inlined_call_operand.vmem [shape: f32[1,512], index: 2, kind: input, shape index: {}]   ;;  %s1008_s3 = inlined_call_operand.hbm [shape: f32[64,512], index: 3, kind: output, shape index: {}]  }
   0x1   :  { %10 = vsyncpa [#allocation3 + $0x1], 0 }
   0x2   :  { %11 = vsyncpa [#allocation4], 0 }
   0x3   :  { %13 = vsyncpa [#allocation4 + $0x1], 0  ;;  %s796_s12 = smov 0   ;;  %s798_s13 = smov 0  }
   0x4   :  { %s800_s14 = smov 0   ;;  %s802_s15 = smov 0  }
   0x5   :  { %s804_s16 = smov 0   ;;  %s806_s17 = smov 0  }
   0x6 LB: > { %s539_s18 = sadd.s32 4294967295, %s765_s17   ;;  %s540_s19 = sadd.s32 4294967294, %s765_s17   ;;  %s765_s17 = sphi %s806_s17, %s19_s17   ;;  %s761_s16 = sphi %s804_s16, %s1022_s16   ;;  %s757_s15 = sphi %s802_s15, %s1021_s15   ;;  %s753_s14 = sphi %s800_s14, %s1020_s14   ;;  %s749_s13 = sphi %s798_s13, %s1019_s13   ;;  %s745_s12 = sphi %s796_s12, %s1018_s12  }
   0x7   : > { %s28_s20 = sadd.s32 1, %s761_s16  ;;  %s64_s21 = sadd.s32 1, %s753_s14 }
   0x8   : > { %p29_p0 = scmp.ge.s32.totalorder %s28_s20, 2  ;;  %p71_p1 = scmp.ne.s32.totalorder %s753_s14, %s749_s13 }
   0x9   : > { %p72_p2 = scmp.eq.s32.totalorder %s765_s17, 0  ;;  %p77_p3 = scmp.ne.s32.totalorder %s749_s13, %s745_s12 }
   0xa   : > { %s1024_s20 = smov (%p29_p0, %s28_s20), 0  ;;  %p78_p5 = scmp.eq.s32.totalorder %s539_s18, 0 }
   0xb   : > { %p837_p4 = por %p72_p2, %p71_p1  ;;  %s61_s23 = ssub.s32 %s761_s16, %s1024_s20 }
   0xc   : > { %p129_p6 = scmp.eq.s32.totalorder %s539_s18, 1  ;;  %p62_p7 = scmp.eq.s32.totalorder %s61_s23, 0 }
   0xd   : > { %p843_p8 = por %p78_p5, %p77_p3  ;;  %p135_p10 = scmp.eq.s32.totalorder %s540_s19, 1 }
   0xe   : > { %p847_p9 = por %p129_p6, %p71_p1  ;;  %p586_p13 = scmp.lt.s32.totalorder %s765_s17, 2 }
   0xf   : > { %s852_s26 = scalar_select %p62_p7, %s753_s14, %s64_s21  }
  0x10   : > { %s1012_s25 = scalar_select %p847_p9, 1, 0 }
  0x11   : > { %p854_p11 = por %p135_p10, %p77_p3  ;;  %s164_s28 = sand.u32 1, %s753_s14  }
  0x12   : > { %s544_s29 = sshll.u32 %s164_s28, 5  ;;  %s568_s30 = sshll.u32 %s761_s16, 7 }
  0x13   : > { %s1013_s27 = scalar_select %p854_p11, 1, 0 }
  0x14   : > { %s865_s6 = scalar_lea.hbm %s1006_s1, %s568_s30  ;;  %s168_s7 = scalar_lea.vmem [#allocation2], %s544_s29 }
  0x15   : > { %s175_s8 = sshll.u32 %s168_s7, 4  ;;  %p871_p0 = pnand %p586_p13, %p837_p4  ;;  %s867_s8 = int_to_ptr.vmem [resolvable:$true] %s175_s8 }
  0x16   : > { %s875_s10 = scalar_lea.sflag [#allocation3], %s164_s28  ;;  %s653_s11 = scalar_lea.hbm %s865_s6, 512 }
  0x17   : > { %p654_p1 = scmp.ne.s32.totalorder %s865_s6, %s653_s11  ;;  %p655_p2 = pneg %p871_p0 }
  0x18   : > { %s658_s21 = scalar_lea.hbm %s1006_s1, 1024  ;;  %p659_p4 = scmp.lt.u32.totalorder %s865_s6, %s1006_s1 }
  0x19   : > { %p656_p3 = pnand %p655_p2, %p654_p1  ;;  %p660_p6 = scmp.lt.u32.totalorder %s658_s21, %s653_s11 }
  0x1a   : > { %p662_p10 = scmp.lt.u32.totalorder %s653_s11, %s865_s6 }
  0x1b   : > { %p657_p5 = pneg %p656_p3  ;;  %p661_p7 = por %p660_p6, %p659_p4 }
  0x1d   : > { %p663_p13 = por %p662_p10, %p661_p7 }
  0x1f   : > { %p664_p12 = pnand %p663_p13, %p657_p5 }
  0x21   : > { %667 = shalt.err (!%p664_p12)
}
  0x22   : > { %s668_s28 = scalar_lea.vmem %s867_s8, 512  ;;  %s767_s29 = smov [#allocation2]  }
  0x23   : > { %p669_p1 = scmp.ne.s32.totalorder %s867_s8, %s668_s28  ;;  %s673_s30 = sshll.u32 %s767_s29, 4  ;;  %s674_s30 = int_to_ptr.vmem [resolvable:$false] %s673_s30 }
  0x24   : > { %s675_s4 = scalar_lea.vmem %s674_s30, 1024  ;;  %p676_p9 = scmp.lt.s32.totalorder %s867_s8, %s674_s30 }
  0x25   : > { %p671_p3 = pnand %p669_p1, %p655_p2  ;;  %p677_p4 = scmp.lt.s32.totalorder %s675_s4, %s668_s28 }
  0x27   : > { %p672_p11 = pneg %p671_p3  ;;  %p678_p6 = por %p677_p4, %p676_p9 }
  0x29   : > { %p679_p7 = pnand %p678_p6, %p672_p11 }
  0x2b   : > { %682 = shalt.err (!%p679_p7)
}
  0x2c   : > { %s768_s5 = smov 256   ;;  %s769_s7 = smov 128  }
  0x2d   : > { %s770_s11 = smov 8   ;;  %p547_p12 = scmp.ge.s32.totalorder %s765_s17, 1 }
  0x2e   : > { %581 = dma.hbm_to_vmem [thread:$0]  (!%p871_p0), %s865_s6, 512, %s867_s8, %s875_s10, %s768_s5, %s769_s7, %s770_s11  }
  0x2f   : > { %p191_p2 = scmp.lt.s32.totalorder %s765_s17, 3 }
  0x31   : > { %p192_p5 = pnand %p547_p12, %p191_p2 }
  0x32   : > { %s906_s18 = sand.u32 (!%p192_p5), 1, %s749_s13  }
  0x33   : > { %195 = sbr.rel (%p192_p5) target bundleno = 310 (0x136), region = 32  ;;  %s548_s19 = sshll.u32 (!%p192_p5), %s906_s18, 5 }
  0x34   : > { %s198_s21 = scalar_lea.sflag (!%p192_p5), [#allocation3], %s906_s18  ;;  %s201_s22 = scalar_lea.vmem (!%p192_p5), [#allocation2], %s548_s19 }
  0x3a   : > { %736 = dma.done.wait (%p843_p8), %s198_s21, 512  }
  0x3b   : > { %738 = vsyncadd (%p843_p8), %s198_s21, 4294966784  ;;  %v771_v0 = vmov 0   ;;  %v643_v1 = vld [vmem:[%s201_s22 + $0x4] ss:$8 sps:$4 sm:$0xff]   ;;  %v645_v2 = vld [vmem:[%s201_s22] ss:$8 sps:$4 sm:$0xff]   ;;  %v262_v9 = vlaneseq }
  0x3c   : > { %357 = vmatprep.mubr.bf16.mxu0 %v771_v0  ;;  %377 = vmatprep.mubr.bf16.mxu1 %v771_v0  ;;  %v646_v3 = vld [vmem:[%s201_s22 + $0x14] ss:$8 sps:$4 sm:$0xff]   ;;  %v648_v4 = vld [vmem:[%s201_s22 + $0x10] ss:$8 sps:$4 sm:$0xff]   ;;  %v649_v5 = vld [vmem:[%s1005_s0] sm:$0xff]   ;;  %vm312_vm0 = vcmask 261120  }
  0x3d   : > { %325 = vmatprep.subr.bf16.mxu0 %v643_v1  ;;  %570 = vmatprep.subr.bf16.mxu1 %v643_v1  ;;  %v650_v6 = vld [vmem:[%s1005_s0 + $0x10] sm:$0xff]   ;;  %v651_v7 = vld [vmem:[%s1005_s0 + $0x8] sm:$0xff]   ;;  %v652_v8 = vld [vmem:[%s1005_s0 + $0x18] sm:$0xff]   ;;  %s550_s30 = sshll.u32 %s757_s15, 1  ;;  %v263_v10 = vshrl.u32 %v262_v9, 7  ;;  %s549_s11 = sshll.u32 %s906_s18, 7 }
  0x3e   : > { %326 = vmatpush1.bf16.msra.mxu0 %v645_v2  ;;  %572 = vmatpush1.bf16.msra.mxu1 %v645_v2  ;;  %p241_p8 = scmp.lt.s32.totalorder %s550_s30, 3  ;;  %s931_s19 = scalar_lea.vmem [#allocation5], %s549_s11 }
  0x3f   : > { %327 = vmatprep.subr.bf16.mxu0 %v646_v3  ;;  %571 = vmatprep.subr.bf16.mxu1 %v646_v3  ;;  %v264_v11 = vsub.s32 0, %v263_v10  ;;  %v268_v13 = vsub.s32 1, %v263_v10  ;;  %s569_s21 = sshll.u32 %s757_s15, 8  ;;  %s431_s22 = sshll.u32 %s931_s19, 4  ;;  %s950_s22 = int_to_ptr.vmem [resolvable:$true] %s431_s22 }
  0x40   : > { %s1026_s30 = smov (!%p241_p8, %s550_s30), 3  ;;  %s946_s15 = scalar_lea.hbm %s1008_s3, %s569_s21 }
  0x41   : > { %s243_s7 = scalar_lea.vmem %s1007_s2, %s1026_s30  ;;  %s415_s24 = scalar_lea.sflag [#allocation4], %s906_s18 }
  0x42   : > { %328 = vmatpush1.bf16.msra.mxu0 %v648_v4  ;;  %573 = vmatpush1.bf16.msra.mxu1 %v648_v4  ;;  %v260_v12 = vld [vmem:[%s243_s7] sm:$0x3]  ;;  %s683_s9 = scalar_lea.vmem %s950_s22, 2048  ;;  %p1015_p11 = scmp.ne.s32.totalorder %s1012_s25, 0 }
  0x43   : > { %v265_v14 = vrot.slane %v260_v12, %v264_v11  ;;  %v269_v15 = vrot.slane %v260_v12, %v268_v13  ;;  %p684_p9 = scmp.ne.s32.totalorder %s950_s22, %s683_s9  ;;  %s772_s10 = smov [#allocation5]  }
  0x44   : > { %s687_s23 = sshll.u32 %s772_s10, 4  ;;  %s688_s23 = int_to_ptr.vmem [resolvable:$false] %s687_s23 }
  0x45   : > { %559 = vmatmul.mubr.msk.bf16.vlgmr.msra.gmra.mrb[0].mxu0 %vm312_vm0, %v649_v5  ;;  %561 = vmatmul.mubr.msk.bf16.vlgmr.msra.gmra.mrb[0].mxu1 %vm312_vm0, %v650_v6  ;;  %p685_p0 = pnand %p684_p9, %p1015_p11  ;;  %s689_s28 = scalar_lea.vmem %s688_s23, 4096 }
  0x46   : > { %367 = vmatprep.mubr.bf16.mxu0 %v771_v0  ;;  %387 = vmatprep.mubr.bf16.mxu1 %v771_v0  ;;  %p690_p13 = scmp.lt.s32.totalorder %s950_s22, %s688_s23  ;;  %p691_p1 = scmp.lt.s32.totalorder %s689_s28, %s683_s9 }
  0x47   : > { %p686_p10 = pneg %p685_p0 }
  0x48   : > { %p692_p3 = por %p691_p1, %p690_p13 }
  0x4a   : > { %p693_p4 = pnand %p692_p3, %p686_p10 }
  0x4d   : > { %560 = vmatmul.mubr.msk.bf16.gmra.mrb[4].mxu0 %vm312_vm0, %v651_v7  ;;  %562 = vmatmul.mubr.msk.bf16.gmra.mrb[4].mxu1 %vm312_vm0, %v652_v8 }
 0x118   : > { %v359_v16 = vpop.f32.mrb[0].mxu0  ;;  %v379_v17 = vpop.f32.mrb[0].mxu1 }
 0x119   : > { %v360_v18 = vadd.f32 %v359_v16, %v265_v14  ;;  %v380_v19 = vadd.f32 %v379_v17, %v265_v14  ;;  %v361_v20 = vpop.f32.mrb[1].mxu0  ;;  %v381_v21 = vpop.f32.mrb[1].mxu1 }
 0x11a   : > { %v362_v22 = vadd.f32 %v361_v20, %v269_v15  ;;  %v382_v23 = vadd.f32 %v381_v21, %v269_v15  ;;  %v363_v24 = vpop.f32.mrb[2].mxu0  ;;  %v383_v25 = vpop.f32.mrb[2].mxu1 }
 0x11b   : > { %398 = vst [vmem:[%s931_s19] sm:$0xff] %v360_v18  ;;  %406 = vst [vmem:[%s931_s19 + $0x40] sm:$0xff] %v380_v19  ;;  %v364_v26 = vadd.f32 %v363_v24, %v265_v14  ;;  %v384_v27 = vadd.f32 %v383_v25, %v265_v14  ;;  %v365_v28 = vpop.f32.mrb[3].mxu0  ;;  %v385_v29 = vpop.f32.mrb[3].mxu1 }
 0x11c   : > { %399 = vst [vmem:[%s931_s19 + $0x8] sm:$0xff] %v362_v22  ;;  %407 = vst [vmem:[%s931_s19 + $0x48] sm:$0xff] %v382_v23  ;;  %v366_v30 = vadd.f32 %v365_v28, %v269_v15  ;;  %v386_v31 = vadd.f32 %v385_v29, %v269_v15 }
 0x11d   : > { %400 = vst [vmem:[%s931_s19 + $0x10] sm:$0xff] %v364_v26  ;;  %408 = vst [vmem:[%s931_s19 + $0x50] sm:$0xff] %v384_v27 }
 0x11e   : > { %401 = vst [vmem:[%s931_s19 + $0x18] sm:$0xff] %v366_v30  ;;  %409 = vst [vmem:[%s931_s19 + $0x58] sm:$0xff] %v386_v31 }
 0x120   : > { %v369_v32 = vpop.f32.mrb[4].mxu0  ;;  %v389_v33 = vpop.f32.mrb[4].mxu1 }
 0x121   : > { %v370_v34 = vadd.f32 %v369_v32, %v265_v14  ;;  %v390_v35 = vadd.f32 %v389_v33, %v265_v14  ;;  %v371_v36 = vpop.f32.mrb[5].mxu0  ;;  %v391_v37 = vpop.f32.mrb[5].mxu1 }
 0x122   : > { %v372_v38 = vadd.f32 %v371_v36, %v269_v15  ;;  %v392_v39 = vadd.f32 %v391_v37, %v269_v15  ;;  %v373_v40 = vpop.f32.mrb[6].mxu0  ;;  %v393_v41 = vpop.f32.mrb[6].mxu1 }
 0x123   : > { %402 = vst [vmem:[%s931_s19 + $0x20] sm:$0xff] %v370_v34  ;;  %410 = vst [vmem:[%s931_s19 + $0x60] sm:$0xff] %v390_v35  ;;  %v374_v42 = vadd.f32 %v373_v40, %v265_v14  ;;  %v394_v43 = vadd.f32 %v393_v41, %v265_v14  ;;  %v375_v44 = vpop.f32.mrb[7].mxu0  ;;  %v395_v45 = vpop.f32.mrb[7].mxu1 }
 0x124   : > { %403 = vst [vmem:[%s931_s19 + $0x28] sm:$0xff] %v372_v38  ;;  %411 = vst [vmem:[%s931_s19 + $0x68] sm:$0xff] %v392_v39  ;;  %v376_v46 = vadd.f32 %v375_v44, %v269_v15  ;;  %v396_v47 = vadd.f32 %v395_v45, %v269_v15 }
 0x125   : > { %404 = vst [vmem:[%s931_s19 + $0x30] sm:$0xff] %v374_v42  ;;  %412 = vst [vmem:[%s931_s19 + $0x70] sm:$0xff] %v394_v43 }
 0x126   : > { %405 = vst [vmem:[%s931_s19 + $0x38] sm:$0xff] %v376_v46  ;;  %413 = vst [vmem:[%s931_s19 + $0x78] sm:$0xff] %v396_v47 }
 0x127   : > { %696 = shalt.err (!%p693_p4)
}
 0x128   : > { %s697_s29 = scalar_lea.hbm %s946_s15, 2048  ;;  %s701_s5 = scalar_lea.hbm %s1008_s3, 4096 }
 0x129   : > { %p698_p6 = scmp.ne.s32.totalorder %s946_s15, %s697_s29  ;;  %p702_p2 = scmp.lt.u32.totalorder %s946_s15, %s1008_s3 }
 0x12a   : > { %p703_p5 = scmp.lt.u32.totalorder %s701_s5, %s697_s29  ;;  %p705_p9 = scmp.lt.u32.totalorder %s697_s29, %s946_s15 }
 0x12b   : > { %p699_p7 = pnand %p698_p6, %p1015_p11 }
 0x12c   : > { %p704_p8 = por %p703_p5, %p702_p2 }
 0x12d   : > { %p700_p12 = pneg %p699_p7 }
 0x12e   : > { %p706_p0 = por %p705_p9, %p704_p8 }
 0x130   : > { %p707_p10 = pnand %p706_p0, %p700_p12 }
 0x132   : > { %710 = shalt.err (!%p707_p10)
}
 0x133   : > { %s773_s19 = smov 256   ;;  %s774_s21 = smov 512  }
 0x134   : > { %s775_s6 = smov 16  }
 0x135   : > { %576 = dma.vmem_to_hbm [thread:$0]  (%p1015_p11), %s950_s22, 2048, %s946_s15, %s415_s24, %s773_s19, %s774_s21, %s775_s6  }
 0x136 PF: > { %s446_s8 = sand.u32 1, %s745_s12   ;;  %p1016_p13 = scmp.ne.s32.totalorder %s1013_s27, 0 }
 0x137   : > { %p1017_p1 = scmp.ge.s32.totalorder %s765_s17, 2  ;;  %s447_s9 = scalar_lea.sflag [#allocation4], %s446_s8 }
 0x139   : > { %p583_p3 = pnand %p1017_p1, %p1016_p13 }
 0x13b   : > { %740 = dma.done.wait (!%p583_p3), %s447_s9, 2048  }
 0x13c   : > { %742 = vsyncadd (!%p583_p3), %s447_s9, 4294965248  ;;  %s19_s17 = sadd.s32 1, %s765_s17   ;;  %s1018_s12 = smov %s749_s13 }
 0x13d   : > { %p16_p4 = scmp.ge.s32.totalorder %s19_s17, 4   ;;  %s1019_s13 = smov %s753_s14 }
 0x13e   : > { %s1020_s14 = smov %s852_s26  ;;  %s1021_s15 = smov %s761_s16 }
 0x13f   : > { %s1022_s16 = smov %s1024_s20  ;;  %18 = sbr.rel (!%p16_p4) target bundleno = 6 (0x6), region = 83 }
 0x146   :  { %452 = vsyncpa [#allocation3], 1 }
 0x147   :  { %454 = vsyncpa [#allocation3 + $0x1], 1 }
 0x148   :  { %455 = vsyncpa [#allocation4], 1 }
 0x149   :  { %457 = vsyncpa [#allocation4 + $0x1], 1 }

</bundles_post_ra>
